<compile_context>
chip_gen: v7x
topology: tpu7x:2x2x1
jax: 0.10.0
libtpu: 0.0.40
codegen_flags: <defaults>
</compile_context>

<pallas_src>
import jax
import jax.numpy as jnp
from jax.experimental import pallas as pl
from jax.experimental.pallas import tpu as pltpu

HIDDEN = 256
NEG_SLOPE = 0.01          # F.leaky_relu default
MAX_BATCH_TILE = 512      # per-step batch tile (multiple of 8); tiny VMEM footprint


def _leaky_relu(x):
    # max(x, slope*x) == leaky_relu for 0 <= slope <= 1; one vmul + vmax.
    return jnp.maximum(x, NEG_SLOPE * x)


def critic_kernel(state_ref, action_ref,
                  w14s_ref, w14a_ref, b14_ref,     # layer 1 (both branches fused)
                  w25_ref, b25_ref,                # layers 2 & 5 packed
                  w36_ref, b36_ref,                # layers 3 & 6 (block-diagonal)
                  q_ref):
    bf16 = jnp.bfloat16
    H = HIDDEN

    # ---- layer 1 (shared input, both branches at once; no external concat) ----
    s = state_ref[...].astype(bf16)
    a = action_ref[...].astype(bf16)
    hg = (jnp.dot(s, w14s_ref[...], preferred_element_type=jnp.float32)
          + jnp.dot(a, w14a_ref[...], preferred_element_type=jnp.float32)
          + b14_ref[...])                          # (TB, 2*H) f32
    hg = _leaky_relu(hg)

    h = hg[:, :H].astype(bf16)                     # Q1 branch activations
    g = hg[:, H:].astype(bf16)                     # Q2 branch activations

    # ---- layer 2 / layer 5 ----
    h2 = jnp.dot(h, w25_ref[0:H, :], preferred_element_type=jnp.float32) + b25_ref[0:1, :]
    g2 = jnp.dot(g, w25_ref[H:2 * H, :], preferred_element_type=jnp.float32) + b25_ref[1:2, :]
    h2 = _leaky_relu(h2).astype(bf16)
    g2 = _leaky_relu(g2).astype(bf16)

    # ---- layer 3 / layer 6 via block-diagonal (2H, 2) weight -> (TB, 2) ----
    q = (jnp.dot(h2, w36_ref[0:H, :], preferred_element_type=jnp.float32)
         + jnp.dot(g2, w36_ref[H:2 * H, :], preferred_element_type=jnp.float32)
         + b36_ref[...])
    q_ref[...] = q.astype(q_ref.dtype)             # single lane-contiguous store


def critic_forward(state, action, params):
    """Pallas-backed forward pass. Returns (q1, q2), each (B, 1) f32."""
    B, state_dim = state.shape
    _, action_dim = action.shape
    w14_s, w14_a, b14, w25, b25, w36, b36 = params["packed"]

    tb = B if B <= MAX_BATCH_TILE else MAX_BATCH_TILE
    grid = (pl.cdiv(B, tb),)

    def tiled(shape):      # batch-tiled operand
        return pl.BlockSpec((tb,) + shape[1:], lambda i: (i,) + (0,) * (len(shape) - 1))

    def resident(shape):   # weights / biases: whole array, constant index map
        return pl.BlockSpec(shape, lambda i: (0,) * len(shape))

    in_arrays = (state, action, w14_s, w14_a, b14, w25, b25, w36, b36)
    in_specs = [tiled(state.shape), tiled(action.shape)] + \
               [resident(a.shape) for a in in_arrays[2:]]

    q = pl.pallas_call(
        critic_kernel,
        grid=grid,
        in_specs=in_specs,
        out_specs=pl.BlockSpec((tb, 2), lambda i: (i, 0)),
        out_shape=jax.ShapeDtypeStruct((B, 2), jnp.float32),
        compiler_params=pltpu.CompilerParams(dimension_semantics=("parallel",)),
    )(*in_arrays)
    return q[:, 0:1], q[:, 1:2]


def init_critic_params(key, state_dim, action_dim, weight_dtype=jnp.bfloat16):
    """torch.nn.Linear-style init (uniform +-1/sqrt(fan_in)), then packed into the
    fused layout the kernel expects. Weights stored (in, out) so y = x @ W + b."""
    H = HIDDEN
    d = state_dim + action_dim

    def linear(k, fan_in, fan_out):
        kw, kb = jax.random.split(k)
        bound = 1.0 / (fan_in ** 0.5)
        w = jax.random.uniform(kw, (fan_in, fan_out), jnp.float32, -bound, bound)
        b = jax.random.uniform(kb, (fan_out,), jnp.float32, -bound, bound)
        return w, b

    k1, k2, k3, k4, k5, k6 = jax.random.split(key, 6)
    w1, b1 = linear(k1, d, H)
    w2, b2 = linear(k2, H, H)
    w3, b3 = linear(k3, H, 1)
    w4, b4 = linear(k4, d, H)
    w5, b5 = linear(k5, H, H)
    w6, b6 = linear(k6, H, 1)

    # layer-1 fusion: [W1 | W4] along the output dim, split by (state, action) rows.
    w14 = jnp.concatenate([w1, w4], axis=1)                     # (d, 2H)
    w14_s = w14[:state_dim].astype(weight_dtype)                # (state_dim, 2H)
    w14_a = w14[state_dim:].astype(weight_dtype)                # (action_dim, 2H)
    b14 = jnp.concatenate([b1, b4])[None, :]                    # (1, 2H) f32

    # layer-2 packing: rows [0:H] = W2, [H:2H] = W5.
    w25 = jnp.concatenate([w2, w5], axis=0).astype(weight_dtype)  # (2H, H)
    b25 = jnp.stack([b2, b5], axis=0)                             # (2, H) f32

    # layer-3 block-diagonal head: col 0 <- W3 on rows [0:H], col 1 <- W6 on rows [H:2H].
    w36 = jnp.zeros((2 * H, 2), jnp.float32)
    w36 = w36.at[:H, 0:1].set(w3).at[H:, 1:2].set(w6).astype(weight_dtype)
    b36 = jnp.concatenate([b3, b6])[None, :]                      # (1, 2) f32

    packed = (w14_s, w14_a, b14, w25, b25, w36, b36)
    raw_f32 = (w1, b1, w2, b2, w3, b3, w4, b4, w5, b5, w6, b6)
    return {"packed": packed, "raw_f32": raw_f32}


def critic_forward_ref_mirror(state, action, params):
    """Plain-JAX reference that mirrors the kernel's bf16-weight / f32-accumulate math."""
    H = HIDDEN
    bf16 = jnp.bfloat16
    w14_s, w14_a, b14, w25, b25, w36, b36 = params["packed"]
    hg = (jnp.dot(state.astype(bf16), w14_s, preferred_element_type=jnp.float32)
          + jnp.dot(action.astype(bf16), w14_a, preferred_element_type=jnp.float32) + b14)
    hg = _leaky_relu(hg)
    h = hg[:, :H].astype(bf16)
    g = hg[:, H:].astype(bf16)
    h2 = _leaky_relu(jnp.dot(h, w25[:H], preferred_element_type=jnp.float32) + b25[0:1]).astype(bf16)
    g2 = _leaky_relu(jnp.dot(g, w25[H:], preferred_element_type=jnp.float32) + b25[1:2]).astype(bf16)
    q = (jnp.dot(h2, w36[:H], preferred_element_type=jnp.float32)
         + jnp.dot(g2, w36[H:], preferred_element_type=jnp.float32) + b36)
    return q[:, 0:1], q[:, 1:2]


def critic_forward_ref_f32(state, action, params):
    """Exact f32 torch-equivalent reference (un-fused, un-quantized)."""
    (w1, b1, w2, b2, w3, b3, w4, b4, w5, b5, w6, b6) = params["raw_f32"]
    sa = jnp.concatenate([state, action], axis=1)
    h = _leaky_relu(sa @ w1 + b1)
    h = _leaky_relu(h @ w2 + b2)
    q1 = h @ w3 + b3
    g = _leaky_relu(sa @ w4 + b4)
    g = _leaky_relu(g @ w5 + b5)
    q2 = g @ w6 + b6
    return q1, q2


if __name__ == "__main__":
    B, STATE_DIM, ACTION_DIM = 8, 24, 8

    key = jax.random.PRNGKey(0)
    kp, ks, ka = jax.random.split(key, 3)

    params = init_critic_params(kp, STATE_DIM, ACTION_DIM)
    state = jax.random.normal(ks, (B, STATE_DIM), jnp.float32)
    action = jax.random.normal(ka, (B, ACTION_DIM), jnp.float32)

    q1, q2 = critic_forward(state, action, params)
    jax.block_until_ready((q1, q2))
    assert q1.shape == (B, 1) and q2.shape == (B, 1)

    # Precision-mirrored reference: should match the kernel tightly.
    q1_m, q2_m = critic_forward_ref_mirror(state, action, params)
    assert jnp.allclose(q1, q1_m, atol=2e-3, rtol=2e-3)
    assert jnp.allclose(q2, q2_m, atol=2e-3, rtol=2e-3)

    # Full-f32 torch-equivalent reference: bf16 weights => loose tolerance.
    q1_f, q2_f = critic_forward_ref_f32(state, action, params)
    assert jnp.allclose(q1, q1_f, atol=5e-2, rtol=5e-2)
    assert jnp.allclose(q2, q2_f, atol=5e-2, rtol=5e-2)

    print("KERNEL_OK")
</pallas_src>

<mosaic_0001>
module attributes {stable_mosaic.version = 11 : i64} {
  func.func @critic_kernel(%arg0: i32, %arg1: memref<8x24xf32, #tpu.memory_space<vmem>>, %arg2: memref<8x8xf32, #tpu.memory_space<vmem>>, %arg3: memref<24x512xbf16, #tpu.memory_space<vmem>>, %arg4: memref<8x512xbf16, #tpu.memory_space<vmem>>, %arg5: memref<1x512xf32, #tpu.memory_space<vmem>>, %arg6: memref<512x256xbf16, #tpu.memory_space<vmem>>, %arg7: memref<2x256xf32, #tpu.memory_space<vmem>>, %arg8: memref<512x2xbf16, #tpu.memory_space<vmem>>, %arg9: memref<1x2xf32, #tpu.memory_space<vmem>>, %arg10: memref<8x2xf32, #tpu.memory_space<vmem>>) attributes {dimension_semantics = [#tpu.dimension_semantics<parallel>], iteration_bounds = array<i64: 1>, scalar_prefetch = 0 : i64, scratch_operands = 0 : i64, tpu.core_type = #tpu.core_type<tc>, window_params = [{transform_indices = @transform_0, window_bounds = array<i64: 8, 24>}, {transform_indices = @transform_1, window_bounds = array<i64: 8, 8>}, {pipeline_mode = #tpu.pipeline_mode<synchronous>, transform_indices = @transform_2, window_bounds = array<i64: 24, 512>}, {pipeline_mode = #tpu.pipeline_mode<synchronous>, transform_indices = @transform_3, window_bounds = array<i64: 8, 512>}, {pipeline_mode = #tpu.pipeline_mode<synchronous>, transform_indices = @transform_4, window_bounds = array<i64: 1, 512>}, {pipeline_mode = #tpu.pipeline_mode<synchronous>, transform_indices = @transform_5, window_bounds = array<i64: 512, 256>}, {pipeline_mode = #tpu.pipeline_mode<synchronous>, transform_indices = @transform_6, window_bounds = array<i64: 2, 256>}, {pipeline_mode = #tpu.pipeline_mode<synchronous>, transform_indices = @transform_7, window_bounds = array<i64: 512, 2>}, {pipeline_mode = #tpu.pipeline_mode<synchronous>, transform_indices = @transform_8, window_bounds = array<i64: 1, 2>}, {transform_indices = @transform_9, window_bounds = array<i64: 8, 2>}]} {
    %c0 = arith.constant 0 : index
    %c0_0 = arith.constant 0 : index
    %0 = vector.load %arg1[%c0, %c0_0] : memref<8x24xf32, #tpu.memory_space<vmem>>, vector<8x24xf32>
    %1 = arith.truncf %0 : vector<8x24xf32> to vector<8x24xbf16>
    %c0_1 = arith.constant 0 : index
    %c0_2 = arith.constant 0 : index
    %2 = vector.load %arg2[%c0_1, %c0_2] : memref<8x8xf32, #tpu.memory_space<vmem>>, vector<8x8xf32>
    %3 = arith.truncf %2 : vector<8x8xf32> to vector<8x8xbf16>
    %c0_3 = arith.constant 0 : index
    %c0_4 = arith.constant 0 : index
    %4 = vector.load %arg3[%c0_3, %c0_4] : memref<24x512xbf16, #tpu.memory_space<vmem>>, vector<24x512xbf16>
    %cst = arith.constant dense<0.000000e+00> : vector<8x512xf32>
    %5 = tpu.matmul %1, %4, %cst {dimension_numbers = #tpu.dot_dimension_numbers<[1], [0], [0], [1], [0, 0, 1, 1], [], []>} : vector<8x24xbf16>, vector<24x512xbf16>, vector<8x512xf32> -> vector<8x512xf32>
    %c0_5 = arith.constant 0 : index
    %c0_6 = arith.constant 0 : index
    %6 = vector.load %arg4[%c0_5, %c0_6] : memref<8x512xbf16, #tpu.memory_space<vmem>>, vector<8x512xbf16>
    %cst_7 = arith.constant dense<0.000000e+00> : vector<8x512xf32>
    %7 = tpu.matmul %3, %6, %cst_7 {dimension_numbers = #tpu.dot_dimension_numbers<[1], [0], [0], [1], [0, 0, 1, 1], [], []>} : vector<8x8xbf16>, vector<8x512xbf16>, vector<8x512xf32> -> vector<8x512xf32>
    %8 = arith.addf %5, %7 : vector<8x512xf32>
    %c0_8 = arith.constant 0 : index
    %c0_9 = arith.constant 0 : index
    %9 = vector.load %arg5[%c0_8, %c0_9] : memref<1x512xf32, #tpu.memory_space<vmem>>, vector<1x512xf32>
    %10 = vector.broadcast %9 : vector<1x512xf32> to vector<8x512xf32>
    %11 = arith.addf %8, %10 : vector<8x512xf32>
    %cst_10 = arith.constant 0.00999999977 : f32
    %12 = vector.broadcast %cst_10 : f32 to vector<8x512xf32>
    %13 = arith.mulf %12, %11 : vector<8x512xf32>
    %14 = arith.maximumf %11, %13 : vector<8x512xf32>
    %15 = vector.extract_strided_slice %14 {offsets = [0, 0], sizes = [8, 256], strides = [1, 1]} : vector<8x512xf32> to vector<8x256xf32>
    %16 = arith.truncf %15 : vector<8x256xf32> to vector<8x256xbf16>
    %17 = vector.extract_strided_slice %14 {offsets = [0, 256], sizes = [8, 256], strides = [1, 1]} : vector<8x512xf32> to vector<8x256xf32>
    %18 = arith.truncf %17 : vector<8x256xf32> to vector<8x256xbf16>
    %c0_11 = arith.constant 0 : index
    %c0_12 = arith.constant 0 : index
    %19 = vector.load %arg6[%c0_11, %c0_12] : memref<512x256xbf16, #tpu.memory_space<vmem>>, vector<256x256xbf16>
    %cst_13 = arith.constant dense<0.000000e+00> : vector<8x256xf32>
    %20 = tpu.matmul %16, %19, %cst_13 {dimension_numbers = #tpu.dot_dimension_numbers<[1], [0], [0], [1], [0, 0, 1, 1], [], []>} : vector<8x256xbf16>, vector<256x256xbf16>, vector<8x256xf32> -> vector<8x256xf32>
    %c0_14 = arith.constant 0 : index
    %c0_15 = arith.constant 0 : index
    %21 = vector.load %arg7[%c0_14, %c0_15] : memref<2x256xf32, #tpu.memory_space<vmem>>, vector<1x256xf32>
    %22 = vector.broadcast %21 : vector<1x256xf32> to vector<8x256xf32>
    %23 = arith.addf %20, %22 : vector<8x256xf32>
    %c256 = arith.constant 256 : index
    %c0_16 = arith.constant 0 : index
    %24 = vector.load %arg6[%c256, %c0_16] : memref<512x256xbf16, #tpu.memory_space<vmem>>, vector<256x256xbf16>
    %cst_17 = arith.constant dense<0.000000e+00> : vector<8x256xf32>
    %25 = tpu.matmul %18, %24, %cst_17 {dimension_numbers = #tpu.dot_dimension_numbers<[1], [0], [0], [1], [0, 0, 1, 1], [], []>} : vector<8x256xbf16>, vector<256x256xbf16>, vector<8x256xf32> -> vector<8x256xf32>
    %c1 = arith.constant 1 : index
    %c0_18 = arith.constant 0 : index
    %26 = vector.load %arg7[%c1, %c0_18] : memref<2x256xf32, #tpu.memory_space<vmem>>, vector<1x256xf32>
    %27 = vector.broadcast %26 : vector<1x256xf32> to vector<8x256xf32>
    %28 = arith.addf %25, %27 : vector<8x256xf32>
    %cst_19 = arith.constant 0.00999999977 : f32
    %29 = vector.broadcast %cst_19 : f32 to vector<8x256xf32>
    %30 = arith.mulf %29, %23 : vector<8x256xf32>
    %31 = arith.maximumf %23, %30 : vector<8x256xf32>
    %32 = arith.truncf %31 : vector<8x256xf32> to vector<8x256xbf16>
    %cst_20 = arith.constant 0.00999999977 : f32
    %33 = vector.broadcast %cst_20 : f32 to vector<8x256xf32>
    %34 = arith.mulf %33, %28 : vector<8x256xf32>
    %35 = arith.maximumf %28, %34 : vector<8x256xf32>
    %36 = arith.truncf %35 : vector<8x256xf32> to vector<8x256xbf16>
    %c0_21 = arith.constant 0 : index
    %c0_22 = arith.constant 0 : index
    %37 = vector.load %arg8[%c0_21, %c0_22] : memref<512x2xbf16, #tpu.memory_space<vmem>>, vector<256x2xbf16>
    %cst_23 = arith.constant dense<0.000000e+00> : vector<8x2xf32>
    %38 = tpu.matmul %32, %37, %cst_23 {dimension_numbers = #tpu.dot_dimension_numbers<[1], [0], [0], [1], [0, 0, 1, 1], [], []>} : vector<8x256xbf16>, vector<256x2xbf16>, vector<8x2xf32> -> vector<8x2xf32>
    %c256_24 = arith.constant 256 : index
    %c0_25 = arith.constant 0 : index
    %39 = vector.load %arg8[%c256_24, %c0_25] : memref<512x2xbf16, #tpu.memory_space<vmem>>, vector<256x2xbf16>
    %cst_26 = arith.constant dense<0.000000e+00> : vector<8x2xf32>
    %40 = tpu.matmul %36, %39, %cst_26 {dimension_numbers = #tpu.dot_dimension_numbers<[1], [0], [0], [1], [0, 0, 1, 1], [], []>} : vector<8x256xbf16>, vector<256x2xbf16>, vector<8x2xf32> -> vector<8x2xf32>
    %41 = arith.addf %38, %40 : vector<8x2xf32>
    %c0_27 = arith.constant 0 : index
    %c0_28 = arith.constant 0 : index
    %42 = vector.load %arg9[%c0_27, %c0_28] : memref<1x2xf32, #tpu.memory_space<vmem>>, vector<1x2xf32>
    %43 = vector.broadcast %42 : vector<1x2xf32> to vector<8x2xf32>
    %44 = arith.addf %41, %43 : vector<8x2xf32>
    %c0_29 = arith.constant 0 : index
    %c0_30 = arith.constant 0 : index
    %45 = vector.load %arg10[%c0_29, %c0_30] : memref<8x2xf32, #tpu.memory_space<vmem>>, vector<8x2xf32>
    tpu.vector_store %arg10[%c0_29, %c0_30], %44 {strides = array<i32>} : memref<8x2xf32, #tpu.memory_space<vmem>>, vector<8x2xf32>,
    return
  }
  func.func @transform_0(%arg0: i32) -> (i32, i32) {
    %c0_i32 = arith.constant 0 : i32
    %c0_i32_0 = arith.constant 0 : i32
    return %arg0, %c0_i32 : i32, i32
  }
  func.func @transform_1(%arg0: i32) -> (i32, i32) {
    %c0_i32 = arith.constant 0 : i32
    %c0_i32_0 = arith.constant 0 : i32
    return %arg0, %c0_i32 : i32, i32
  }
  func.func @transform_2(%arg0: i32) -> (i32, i32) {
    %c0_i32 = arith.constant 0 : i32
    %c0_i32_0 = arith.constant 0 : i32
    %c0_i32_1 = arith.constant 0 : i32
    return %c0_i32, %c0_i32_0 : i32, i32
  }
  func.func @transform_3(%arg0: i32) -> (i32, i32) {
    %c0_i32 = arith.constant 0 : i32
    %c0_i32_0 = arith.constant 0 : i32
    %c0_i32_1 = arith.constant 0 : i32
    return %c0_i32, %c0_i32_0 : i32, i32
  }
  func.func @transform_4(%arg0: i32) -> (i32, i32) {
    %c0_i32 = arith.constant 0 : i32
    %c0_i32_0 = arith.constant 0 : i32
    %c0_i32_1 = arith.constant 0 : i32
    return %c0_i32, %c0_i32_0 : i32, i32
  }
  func.func @transform_5(%arg0: i32) -> (i32, i32) {
    %c0_i32 = arith.constant 0 : i32
    %c0_i32_0 = arith.constant 0 : i32
    %c0_i32_1 = arith.constant 0 : i32
    return %c0_i32, %c0_i32_0 : i32, i32
  }
  func.func @transform_6(%arg0: i32) -> (i32, i32) {
    %c0_i32 = arith.constant 0 : i32
    %c0_i32_0 = arith.constant 0 : i32
    %c0_i32_1 = arith.constant 0 : i32
    return %c0_i32, %c0_i32_0 : i32, i32
  }
  func.func @transform_7(%arg0: i32) -> (i32, i32) {
    %c0_i32 = arith.constant 0 : i32
    %c0_i32_0 = arith.constant 0 : i32
    %c0_i32_1 = arith.constant 0 : i32
    return %c0_i32, %c0_i32_0 : i32, i32
  }
  func.func @transform_8(%arg0: i32) -> (i32, i32) {
    %c0_i32 = arith.constant 0 : i32
    %c0_i32_0 = arith.constant 0 : i32
    %c0_i32_1 = arith.constant 0 : i32
    return %c0_i32, %c0_i32_0 : i32, i32
  }
  func.func @transform_9(%arg0: i32) -> (i32, i32) {
    %c0_i32 = arith.constant 0 : i32
    %c0_i32_0 = arith.constant 0 : i32
    return %arg0, %c0_i32 : i32, i32
  }
}

</mosaic_0001>

<bundles_post_ra>
// kernel: tpu_custom_call.1
= control target key start
LH: loop header
LB: loop body
LE: loop exit
PB: predicated region body
PF: predicated region fallthrough
CT: control target
= control target key end

     0   :  { %14 = vsyncpa [#allocation3], 0  ;;  %s1520_s30 = smov [#allocation2]   ;;  %s1745_s0 = inlined_call_operand.vmem [shape: f32[8,24], index: 0, kind: input, shape index: {}]   ;;  %s1746_s1 = inlined_call_operand.vmem [shape: f32[8,8], index: 1, kind: input, shape index: {}]   ;;  %s1747_s2 = inlined_call_operand.vmem [shape: bf16[24,512], index: 2, kind: input, shape index: {}]   ;;  %s1748_s3 = inlined_call_operand.vmem [shape: bf16[8,512], index: 3, kind: input, shape index: {}]   ;;  %s1749_s4 = inlined_call_operand.vmem [shape: f32[1,512], index: 4, kind: input, shape index: {}]   ;;  %s1750_s5 = inlined_call_operand.hbm [shape: bf16[512,256], index: 5, kind: input, shape index: {}]   ;;  %s1751_s6 = inlined_call_operand.vmem [shape: f32[2,256], index: 6, kind: input, shape index: {}]   ;;  %s1752_s7 = inlined_call_operand.vmem [shape: bf16[512,2], index: 7, kind: input, shape index: {}]   ;;  %s1753_s8 = inlined_call_operand.vmem [shape: f32[1,2], index: 8, kind: input, shape index: {}]   ;;  %s1754_s9 = inlined_call_operand.vmem [shape: f32[8,2], index: 9, kind: output, shape index: {}]  }
   0x1   :  { %s30_s10 = sshll.u32 %s1520_s30, 4  ;;  %s1496_s13 = scalar_lea.hbm %s1750_s5, 8192  ;;  %s31_s10 = int_to_ptr.vmem [resolvable:$true] %s30_s10 }
   0x2   :  { %p1497_p0 = scmp.ne.s32.totalorder %s1750_s5, %s1496_s13  ;;  %p1500_p1 = scmp.lt.u32.totalorder %s1496_s13, %s1750_s5 }
   0x4   :  { %p1502_p2 = pnand %p1500_p1, %p1497_p0 }
   0x6   :  { %1505 = shalt.err (!%p1502_p2)
}
   0x7   :  { %s1506_s18 = scalar_lea.vmem %s31_s10, 8192  ;;  %p1511_p4 = scmp.lt.s32.totalorder %s31_s10, %s31_s10 }
   0x8   :  { %p1507_p3 = scmp.ne.s32.totalorder %s31_s10, %s1506_s18  ;;  %p1512_p5 = scmp.lt.s32.totalorder %s1506_s18, %s1506_s18 }
   0xa   :  { %p1513_p6 = por %p1512_p5, %p1511_p4 }
   0xc   :  { %p1514_p7 = pnand %p1513_p6, %p1507_p3 }
   0xe   :  { %1517 = shalt.err (!%p1514_p7)
}
   0xf   :  { %s1521_s19 = smov 128   ;;  %s1522_s20 = smov 8  }
  0x10   :  { %36 = dma.hbm_to_vmem [thread:$0]  %s1750_s5, 8192, %s31_s10, [#allocation3], %s1521_s19, %s1521_s19, %s1522_s20  }
  0x11   :  { %1518 = dma.done.wait [#allocation3], 8192  }
  0x12   :  { %1519 = vsyncadd [#allocation3], 4294959104  ;;  %v1523_v0 = vmov 0   ;;  %v57_v1 = vld [vmem:[%s1748_s3] sm:$0xff]  ;;  %vm73_vm0 = vcmask 1043456   ;;  %v58_v2 = vld [vmem:[%s1748_s3 + $0x8] sm:$0xff] }
  0x13   :  { %118 = vmatprep.mubr.bf16.mxu0 %v1523_v0  ;;  %159 = vmatprep.mubr.bf16.mxu1 %v1523_v0  ;;  %v49_v3 = vld [vmem:[%s1746_s1] sm:$0xff]  ;;  %v1189_v4 = vcombine.high %v57_v1, %v57_v1  ;;  %v1191_v5 = vcombine.high %v58_v2, %v58_v2  ;;  %v1188_v6 = vcombine.low %v57_v1, %v57_v1  ;;  %v1363_v13 = vld [vmem:[%s1747_s2 + $0xc] ss:$16 sps:$4 sm:$0xff]   ;;  %vm69_vm1 = vcmask 64512   ;;  %v1361_v14 = vld [vmem:[%s1747_s2 + $0x8] ss:$16 sps:$4 sm:$0xff]  }
  0x14   :  { %v1190_v7 = vcombine.low %v58_v2, %v58_v2  ;;  %v1360_v8 = vld [vmem:[%s1747_s2 + $0x4] ss:$16 sps:$4 sm:$0xff]   ;;  %v50_v11 = vpack.c.bf16 %v49_v3, %v49_v3  ;;  %v1358_v12 = vld [vmem:[%s1747_s2] ss:$16 sps:$4 sm:$0xff]   ;;  %v56_v16 = vld [vmem:[%s1747_s2 + $0x28] sm:$0xff]  ;;  %vm198_vm2 = vcmask 195584  }
  0x15   :  { %1192 = vmatprep.subr.msk.bf16.mxu0 %vm73_vm0, %v1189_v4  ;;  %1194 = vmatprep.subr.msk.bf16.mxu1 %vm73_vm0, %v1191_v5  ;;  %v75_v9 = vsel %vm73_vm0, %v1188_v6, 0  ;;  %v55_v15 = vld [vmem:[%s1747_s2 + $0x20] sm:$0xff]  ;;  %v1203_v18 = vcombine.high %v56_v16, %v56_v16  ;;  %v1202_v20 = vcombine.low %v56_v16, %v56_v16  ;;  %v1376_v29 = vld [vmem:[#allocation2 + $0x14] ss:$8 sps:$4 sm:$0xff]   ;;  %v1374_v31 = vld [vmem:[#allocation2 + $0x10] ss:$8 sps:$4 sm:$0xff]  }
  0x16   :  { %v81_v10 = vsel %vm73_vm0, %v1190_v7, 0  ;;  %87 = vmatpush1.bf16.msra.mxu0 %v75_v9  ;;  %v1201_v17 = vcombine.high %v55_v15, %v55_v15  ;;  %v1200_v19 = vcombine.low %v55_v15, %v55_v15  ;;  %v47_v21 = vld [vmem:[%s1745_s0] sm:$0xff]  ;;  %v1379_v30 = vld [vmem:[#allocation2 + $0x114] ss:$8 sps:$4 sm:$0xff]   ;;  %v1377_v32 = vld [vmem:[#allocation2 + $0x110] ss:$8 sps:$4 sm:$0xff]  }
  0x17   :  { %128 = vmatpush1.bf16.msra.mxu1 %v81_v10  ;;  %214 = vmatprep.subr.bf16.mxu0 %v1360_v8  ;;  %v1370_v22 = vld [vmem:[#allocation2 + $0x4] ss:$8 sps:$4 sm:$0xff]   ;;  %v209_v24 = vsel %vm73_vm0, %v1202_v20, 0  ;;  %v48_v26 = vpack.c.bf16 %v47_v21, %v47_v21  ;;  %v1368_v27 = vld [vmem:[#allocation2] ss:$8 sps:$4 sm:$0xff]   ;;  %vm1181_vm3 = vcmask 15360  }
  0x18   :  { %255 = vmatprep.subr.bf16.mxu1 %v1363_v13  ;;  %v203_v23 = vsel %vm73_vm0, %v1200_v19, 0  ;;  %v1373_v25 = vld [vmem:[#allocation2 + $0x104] ss:$8 sps:$4 sm:$0xff]   ;;  %v1371_v28 = vld [vmem:[#allocation2 + $0x100] ss:$8 sps:$4 sm:$0xff]  }
  0x19   :  { %1193 = vmatmul.mubr.msk.bf16.vlgmr.msra.gmra.mrb[0].mxu0 %vm69_vm1, %v50_v11  ;;  %v1382_v33 = vld [vmem:[#allocation2 + $0x24] ss:$8 sps:$4 sm:$0xff]   ;;  %v1380_v35 = vld [vmem:[#allocation2 + $0x20] ss:$8 sps:$4 sm:$0xff]   ;;  %v1388_v37 = vld [vmem:[#allocation2 + $0x34] ss:$8 sps:$4 sm:$0xff]  }
  0x1a   :  { %1195 = vmatmul.mubr.msk.bf16.vlgmr.msra.gmra.mrb[0].mxu1 %vm69_vm1, %v50_v11  ;;  %215 = vmatpush1.bf16.msra.mxu0 %v1358_v12  ;;  %v1385_v34 = vld [vmem:[#allocation2 + $0x124] ss:$8 sps:$4 sm:$0xff]   ;;  %v1383_v36 = vld [vmem:[#allocation2 + $0x120] ss:$8 sps:$4 sm:$0xff]   ;;  %v1391_v38 = vld [vmem:[#allocation2 + $0x134] ss:$8 sps:$4 sm:$0xff]  }
  0x1b   :  { %256 = vmatpush1.bf16.msra.mxu1 %v1361_v14  ;;  %1204 = vmatprep.subr.msk.bf16.mxu0 %vm73_vm0, %v1201_v17  ;;  %v1386_v39 = vld [vmem:[#allocation2 + $0x30] ss:$8 sps:$4 sm:$0xff]   ;;  %v1394_v41 = vld [vmem:[#allocation2 + $0x44] ss:$8 sps:$4 sm:$0xff]   ;;  %v1392_v43 = vld [vmem:[#allocation2 + $0x40] ss:$8 sps:$4 sm:$0xff]  }
  0x1c   :  { %1206 = vmatprep.subr.msk.bf16.mxu1 %vm73_vm0, %v1203_v18  ;;  %246 = vmatprep.mubr.bf16.mxu0 %v1523_v0  ;;  %v1389_v40 = vld [vmem:[#allocation2 + $0x130] ss:$8 sps:$4 sm:$0xff]   ;;  %v1397_v42 = vld [vmem:[#allocation2 + $0x144] ss:$8 sps:$4 sm:$0xff]   ;;  %v1395_v44 = vld [vmem:[#allocation2 + $0x140] ss:$8 sps:$4 sm:$0xff]  }
  0x1d   :  { %287 = vmatprep.mubr.bf16.mxu1 %v1523_v0  ;;  %v1400_v45 = vld [vmem:[#allocation2 + $0x54] ss:$8 sps:$4 sm:$0xff]   ;;  %v1398_v47 = vld [vmem:[#allocation2 + $0x50] ss:$8 sps:$4 sm:$0xff]   ;;  %v1406_v49 = vld [vmem:[#allocation2 + $0x64] ss:$8 sps:$4 sm:$0xff]  }
  0x1e   :  { %217 = vmatpush1.bf16.msra.mxu0 %v203_v23  ;;  %v1403_v46 = vld [vmem:[#allocation2 + $0x154] ss:$8 sps:$4 sm:$0xff]   ;;  %v1401_v48 = vld [vmem:[#allocation2 + $0x150] ss:$8 sps:$4 sm:$0xff]   ;;  %v1409_v50 = vld [vmem:[#allocation2 + $0x164] ss:$8 sps:$4 sm:$0xff]  }
  0x1f   :  { %258 = vmatpush1.bf16.msra.mxu1 %v209_v24  ;;  %538 = vmatprep.subr.bf16.mxu0 %v1370_v22  ;;  %v1404_v51 = vld [vmem:[#allocation2 + $0x60] ss:$8 sps:$4 sm:$0xff]   ;;  %v1412_v53 = vld [vmem:[#allocation2 + $0x74] ss:$8 sps:$4 sm:$0xff]   ;;  %v1410_v55 = vld [vmem:[#allocation2 + $0x70] ss:$8 sps:$4 sm:$0xff]  }
  0x20   :  { %784 = vmatprep.subr.bf16.mxu1 %v1373_v25  ;;  %v1407_v52 = vld [vmem:[#allocation2 + $0x160] ss:$8 sps:$4 sm:$0xff]   ;;  %v1415_v54 = vld [vmem:[#allocation2 + $0x174] ss:$8 sps:$4 sm:$0xff]   ;;  %v1413_v56 = vld [vmem:[#allocation2 + $0x170] ss:$8 sps:$4 sm:$0xff]  }
  0x21   :  { %1205 = vmatmul.mubr.msk.bf16.vlgmr.msra.gmra.mrb[4].mxu0 %vm198_vm2, %v48_v26  ;;  %v1418_v57 = vld [vmem:[#allocation2 + $0x84] ss:$8 sps:$4 sm:$0xff]   ;;  %v1416_v59 = vld [vmem:[#allocation2 + $0x80] ss:$8 sps:$4 sm:$0xff]   ;;  %v1424_v61 = vld [vmem:[#allocation2 + $0x94] ss:$8 sps:$4 sm:$0xff]  }
  0x22   :  { %1207 = vmatmul.mubr.msk.bf16.vlgmr.msra.gmra.mrb[4].mxu1 %vm198_vm2, %v48_v26  ;;  %539 = vmatpush1.bf16.msra.mxu0 %v1368_v27  ;;  %v1421_v58 = vld [vmem:[#allocation2 + $0x184] ss:$8 sps:$4 sm:$0xff]   ;;  %v1419_v60 = vld [vmem:[#allocation2 + $0x180] ss:$8 sps:$4 sm:$0xff]   ;;  %v1427_v62 = vld [vmem:[#allocation2 + $0x194] ss:$8 sps:$4 sm:$0xff]   ;;  %v298_v27 = vlaneseq }
  0x23   :  { %785 = vmatpush1.bf16.msra.mxu1 %v1371_v28  ;;  %540 = vmatprep.subr.bf16.mxu0 %v1376_v29  ;;  %v1422_v63 = vld [vmem:[#allocation2 + $0x90] ss:$8 sps:$4 sm:$0xff]   ;;  %v1430_v1 = vld [vmem:[#allocation2 + $0xa4] ss:$8 sps:$4 sm:$0xff]   ;;  %v1428_v3 = vld [vmem:[#allocation2 + $0xa0] ss:$8 sps:$4 sm:$0xff]  }
  0x24   :  { %786 = vmatprep.subr.bf16.mxu1 %v1379_v30  ;;  %v1425_v0 = vld [vmem:[#allocation2 + $0x190] ss:$8 sps:$4 sm:$0xff]   ;;  %v1433_v2 = vld [vmem:[#allocation2 + $0x1a4] ss:$8 sps:$4 sm:$0xff]   ;;  %v1431_v4 = vld [vmem:[#allocation2 + $0x1a0] ss:$8 sps:$4 sm:$0xff]  }
  0x25   :  { %v1436_v5 = vld [vmem:[#allocation2 + $0xb4] ss:$8 sps:$4 sm:$0xff]   ;;  %v1434_v7 = vld [vmem:[#allocation2 + $0xb0] ss:$8 sps:$4 sm:$0xff]   ;;  %v1440_v9 = vld [vmem:[#allocation2 + $0xc0] ss:$8 sps:$4 sm:$0xff]  }
  0x26   :  { %541 = vmatpush1.bf16.msra.mxu0 %v1374_v31  ;;  %v1439_v6 = vld [vmem:[#allocation2 + $0x1b4] ss:$8 sps:$4 sm:$0xff]   ;;  %v1437_v8 = vld [vmem:[#allocation2 + $0x1b0] ss:$8 sps:$4 sm:$0xff]   ;;  %v1442_v10 = vld [vmem:[#allocation2 + $0xc4] ss:$8 sps:$4 sm:$0xff]  }
  0x27   :  { %787 = vmatpush1.bf16.msra.mxu1 %v1377_v32  ;;  %542 = vmatprep.subr.bf16.mxu0 %v1382_v33  ;;  %v1443_v11 = vld [vmem:[#allocation2 + $0x1c0] ss:$8 sps:$4 sm:$0xff]   ;;  %v1445_v12 = vld [vmem:[#allocation2 + $0x1c4] ss:$8 sps:$4 sm:$0xff]   ;;  %v1448_v13 = vld [vmem:[#allocation2 + $0xd4] ss:$8 sps:$4 sm:$0xff]  }
  0x28   :  { %788 = vmatprep.subr.bf16.mxu1 %v1385_v34  ;;  %v1451_v14 = vld [vmem:[#allocation2 + $0x1d4] ss:$8 sps:$4 sm:$0xff]   ;;  %v1446_v15 = vld [vmem:[#allocation2 + $0xd0] ss:$8 sps:$4 sm:$0xff]   ;;  %v1454_v17 = vld [vmem:[#allocation2 + $0xe4] ss:$8 sps:$4 sm:$0xff]  }
  0x29   :  { %v1449_v16 = vld [vmem:[#allocation2 + $0x1d0] ss:$8 sps:$4 sm:$0xff]   ;;  %v1457_v18 = vld [vmem:[#allocation2 + $0x1e4] ss:$8 sps:$4 sm:$0xff]   ;;  %v1452_v19 = vld [vmem:[#allocation2 + $0xe0] ss:$8 sps:$4 sm:$0xff]  }
  0x2a   :  { %543 = vmatpush1.bf16.msra.mxu0 %v1380_v35  ;;  %v1455_v20 = vld [vmem:[#allocation2 + $0x1e0] ss:$8 sps:$4 sm:$0xff]   ;;  %v1460_v21 = vld [vmem:[#allocation2 + $0xf4] ss:$8 sps:$4 sm:$0xff]   ;;  %v1458_v23 = vld [vmem:[#allocation2 + $0xf0] ss:$8 sps:$4 sm:$0xff]  }
  0x2b   :  { %789 = vmatpush1.bf16.msra.mxu1 %v1383_v36  ;;  %544 = vmatprep.subr.bf16.mxu0 %v1388_v37  ;;  %v1463_v22 = vld [vmem:[#allocation2 + $0x1f4] ss:$8 sps:$4 sm:$0xff]   ;;  %v1461_v24 = vld [vmem:[#allocation2 + $0x1f0] ss:$8 sps:$4 sm:$0xff]   ;;  %v1464_v25 = vld [vmem:[%s1752_s7 + $0xc0] sm:$0xff]   ;;  %v299_v28 = vshrl.u32 %v298_v27, 7 }
  0x2c   :  { %790 = vmatprep.subr.bf16.mxu1 %v1391_v38  ;;  %v1465_v26 = vld [vmem:[%s1752_s7 + $0x40] sm:$0xff]  }
  0x2d   :  { %v1630_v37 = vsub.s32 0, %v299_v28  ;;  %v308_v38 = vsub.s32 2, %v299_v28  ;;  %v1483_v27 = vld [vmem:[%s1752_s7 + $0x20] sm:$0xff]  }
  0x2e   :  { %545 = vmatpush1.bf16.msra.mxu0 %v1386_v39  ;;  %v296_v39 = vld [vmem:[%s1749_s4] sm:$0xf] }
  0x2f   :  { %791 = vmatpush1.bf16.msra.mxu1 %v1389_v40  ;;  %546 = vmatprep.subr.bf16.mxu0 %v1394_v41  ;;  %v1635_v40 = vsub.s32 1, %v299_v28  ;;  %v312_v41 = vsub.s32 3, %v299_v28  ;;  %v1484_v28 = vld [vmem:[%s1752_s7 + $0xe8] sm:$0xff]  }
  0x30   :  { %792 = vmatprep.subr.bf16.mxu1 %v1397_v42  ;;  %v301_v42 = vrot.slane %v296_v39, %v1630_v37 }
  0x32   :  { %547 = vmatpush1.bf16.msra.mxu0 %v1392_v43  ;;  %v309_v43 = vrot.slane %v296_v39, %v308_v38  ;;  %v1493_v38 = vld [vmem:[%s1752_s7 + $0x78] sm:$0xff]  }
  0x33   :  { %793 = vmatpush1.bf16.msra.mxu1 %v1395_v44  ;;  %548 = vmatprep.subr.bf16.mxu0 %v1400_v45 }
  0x34   :  { %794 = vmatprep.subr.bf16.mxu1 %v1403_v46  ;;  %v305_v46 = vrot.slane %v296_v39, %v1635_v40 }
  0x36   :  { %549 = vmatpush1.bf16.msra.mxu0 %v1398_v47  ;;  %v313_v47 = vrot.slane %v296_v39, %v312_v41  ;;  %v1494_v39 = vld [vmem:[%s1752_s7 + $0xb8] sm:$0xff]  }
  0x37   :  { %795 = vmatpush1.bf16.msra.mxu1 %v1401_v48  ;;  %550 = vmatprep.subr.bf16.mxu0 %v1406_v49  ;;  %v1495_v41 = vld [vmem:[%s1752_s7 + $0x38] sm:$0xff]  }
  0x38   :  { %796 = vmatprep.subr.bf16.mxu1 %v1409_v50 }
  0x3a   :  { %551 = vmatpush1.bf16.msra.mxu0 %v1404_v51 }
  0x3b   :  { %797 = vmatpush1.bf16.msra.mxu1 %v1407_v52  ;;  %552 = vmatprep.subr.bf16.mxu0 %v1412_v53 }
  0x3c   :  { %798 = vmatprep.subr.bf16.mxu1 %v1415_v54 }
  0x3e   :  { %553 = vmatpush1.bf16.msra.mxu0 %v1410_v55 }
  0x3f   :  { %799 = vmatpush1.bf16.msra.mxu1 %v1413_v56  ;;  %554 = vmatprep.subr.bf16.mxu0 %v1418_v57 }
  0x40   :  { %800 = vmatprep.subr.bf16.mxu1 %v1421_v58 }
  0x42   :  { %555 = vmatpush1.bf16.msra.mxu0 %v1416_v59 }
  0x43   :  { %801 = vmatpush1.bf16.msra.mxu1 %v1419_v60  ;;  %556 = vmatprep.subr.bf16.mxu0 %v1424_v61 }
  0x44   :  { %802 = vmatprep.subr.bf16.mxu1 %v1427_v62 }
  0x46   :  { %557 = vmatpush1.bf16.msra.mxu0 %v1422_v63 }
  0x47   :  { %803 = vmatpush1.bf16.msra.mxu1 %v1425_v0  ;;  %558 = vmatprep.subr.bf16.mxu0 %v1430_v1 }
  0x48   :  { %804 = vmatprep.subr.bf16.mxu1 %v1433_v2 }
  0x4a   :  { %559 = vmatpush1.bf16.msra.mxu0 %v1428_v3 }
  0x4b   :  { %805 = vmatpush1.bf16.msra.mxu1 %v1431_v4  ;;  %560 = vmatprep.subr.bf16.mxu0 %v1436_v5 }
  0x4c   :  { %806 = vmatprep.subr.bf16.mxu1 %v1439_v6 }
  0x4e   :  { %561 = vmatpush1.bf16.msra.mxu0 %v1434_v7 }
  0x4f   :  { %807 = vmatpush1.bf16.msra.mxu1 %v1437_v8  ;;  %562 = vmatprep.subr.bf16.mxu0 %v1442_v10  ;;  %v1466_v8 = vld [vmem:[%s1752_s7 + $0x80] sm:$0xff]  }
  0x50   :  { %808 = vmatprep.subr.bf16.mxu1 %v1445_v12  ;;  %v1468_v12 = vld [vmem:[%s1752_s7 + $0xc8] sm:$0xff]  }
  0x52   :  { %563 = vmatpush1.bf16.msra.mxu0 %v1440_v9  ;;  %v1467_v9 = vld [vmem:[%s1752_s7] sm:$0xff]  }
  0x53   :  { %809 = vmatpush1.bf16.msra.mxu1 %v1443_v11  ;;  %564 = vmatprep.subr.bf16.mxu0 %v1448_v13  ;;  %v1469_v13 = vld [vmem:[%s1752_s7 + $0x48] sm:$0xff]  }
  0x54   :  { %810 = vmatprep.subr.bf16.mxu1 %v1451_v14  ;;  %v1470_v14 = vld [vmem:[%s1752_s7 + $0x88] sm:$0xff]  }
  0x56   :  { %565 = vmatpush1.bf16.msra.mxu0 %v1446_v15  ;;  %v1471_v15 = vld [vmem:[%s1752_s7 + $0x8] sm:$0xff]  }
  0x57   :  { %811 = vmatpush1.bf16.msra.mxu1 %v1449_v16  ;;  %566 = vmatprep.subr.bf16.mxu0 %v1454_v17  ;;  %v1472_v16 = vld [vmem:[%s1752_s7 + $0xd0] sm:$0xff]  }
  0x58   :  { %812 = vmatprep.subr.bf16.mxu1 %v1457_v18  ;;  %v1473_v17 = vld [vmem:[%s1752_s7 + $0x50] sm:$0xff]  }
  0x59   :  { %v1474_v18 = vld [vmem:[%s1752_s7 + $0x90] sm:$0xff]  }
  0x5a   :  { %567 = vmatpush1.bf16.msra.mxu0 %v1452_v19  ;;  %v1475_v19 = vld [vmem:[%s1752_s7 + $0x10] sm:$0xff]  }
  0x5b   :  { %813 = vmatpush1.bf16.msra.mxu1 %v1455_v20  ;;  %568 = vmatprep.subr.bf16.mxu0 %v1460_v21  ;;  %v1476_v20 = vld [vmem:[%s1752_s7 + $0xd8] sm:$0xff]  }
  0x5c   :  { %814 = vmatprep.subr.bf16.mxu1 %v1463_v22  ;;  %v1477_v21 = vld [vmem:[%s1752_s7 + $0x58] sm:$0xff]  }
  0x5d   :  { %v1478_v22 = vld [vmem:[%s1752_s7 + $0x98] sm:$0xff]  }
  0x5e   :  { %569 = vmatpush1.bf16.msra.mxu0 %v1458_v23  ;;  %v1479_v23 = vld [vmem:[%s1752_s7 + $0x18] sm:$0xff]  }
  0x5f   :  { %815 = vmatpush1.bf16.msra.mxu1 %v1461_v24  ;;  %1306 = vmatprep.subr.bf16.mxu0 %v1464_v25  ;;  %v1480_v24 = vld [vmem:[%s1752_s7 + $0xe0] sm:$0xff]  }
  0x60   :  { %1328 = vmatprep.subr.bf16.mxu1 %v1465_v26  ;;  %v1481_v25 = vld [vmem:[%s1752_s7 + $0x60] sm:$0xff]  }
  0x61   :  { %v1482_v26 = vld [vmem:[%s1752_s7 + $0xa0] sm:$0xff]  }
  0xec   :  { %v120_v29 = vpop.f32.mrb[0].mxu0 }
  0xed   :  { %v161_v30 = vpop.f32.mrb[0].mxu1  ;;  %v122_v31 = vpop.f32.mrb[1].mxu0 }
  0xee   :  { %v163_v32 = vpop.f32.mrb[1].mxu1  ;;  %v124_v33 = vpop.f32.mrb[2].mxu0 }
  0xef   :  { %v165_v34 = vpop.f32.mrb[2].mxu1  ;;  %v125_v35 = vpop.f32.mrb[3].mxu0  ;;  %v1489_v33 = vld [vmem:[%s1752_s7 + $0x70] sm:$0xff]  }
  0xf0   :  { %v166_v36 = vpop.f32.mrb[3].mxu1  ;;  %v1490_v34 = vld [vmem:[%s1752_s7 + $0xb0] sm:$0xff]  }
  0xf1   :  { %v1491_v35 = vld [vmem:[%s1752_s7 + $0x30] sm:$0xff]   ;;  %v1492_v36 = vld [vmem:[%s1752_s7 + $0xf8] sm:$0xff]  }
  0xf4   :  { %v248_v44 = vpop.f32.mrb[4].mxu0 }
  0xf5   :  { %v289_v45 = vpop.f32.mrb[4].mxu1  ;;  %v249_v48 = vadd.f32 %v248_v44, %v120_v29  ;;  %v250_v50 = vpop.f32.mrb[5].mxu0  ;;  %v1485_v29 = vld [vmem:[%s1752_s7 + $0x68] sm:$0xff]  }
  0xf6   :  { %v290_v49 = vadd.f32 %v289_v45, %v161_v30  ;;  %v291_v51 = vpop.f32.mrb[5].mxu1  ;;  %v251_v52 = vadd.f32 %v250_v50, %v122_v31  ;;  %v252_v54 = vpop.f32.mrb[6].mxu0  ;;  %v1486_v30 = vld [vmem:[%s1752_s7 + $0xa8] sm:$0xff]  }
  0xf7   :  { %v292_v53 = vadd.f32 %v291_v51, %v163_v32  ;;  %v293_v55 = vpop.f32.mrb[6].mxu1  ;;  %v318_v56 = vadd.f32 %v301_v42, %v249_v48  ;;  %v253_v58 = vpop.f32.mrb[7].mxu0  ;;  %v1487_v31 = vld [vmem:[%s1752_s7 + $0x28] sm:$0xff]   ;;  %v1488_v32 = vld [vmem:[%s1752_s7 + $0xf0] sm:$0xff]  }
  0xf8   :  { %v320_v57 = vadd.f32 %v309_v43, %v290_v49  ;;  %v294_v59 = vpop.f32.mrb[7].mxu1  ;;  %v319_v60 = vadd.f32 %v305_v46, %v251_v52  ;;  %v366_v42 = vld [vmem:[%s1751_s6] ss:$2 sm:$0x3] }
  0xf9   :  { %v321_v61 = vadd.f32 %v313_v47, %v292_v53  ;;  %v322_v62 = vmul.f32 0.01, %v318_v56  ;;  %v1240_v43 = vld [vmem:[%s1751_s6 + $0x1] ss:$2 sm:$0x3]  ;;  %v371_v44 = vrot.slane %v366_v42, %v1630_v37  ;;  %v375_v46 = vrot.slane %v366_v42, %v1635_v40 }
  0xfa   :  { %v324_v63 = vmul.f32 0.01, %v320_v57  ;;  %v323_v0 = vmul.f32 0.01, %v319_v60  ;;  %v617_v45 = vrot.slane %v1240_v43, %v1630_v37  ;;  %v621_v47 = vrot.slane %v1240_v43, %v1635_v40 }
  0xfb   :  { %v325_v1 = vmul.f32 0.01, %v321_v61  ;;  %v326_v2 = vmax.f32 %v318_v56, %v322_v62 }
  0xfc   :  { %v328_v3 = vmax.f32 %v320_v57, %v324_v63  ;;  %v327_v4 = vmax.f32 %v319_v60, %v323_v0 }
  0xfd   :  { %v329_v5 = vmax.f32 %v321_v61, %v325_v1  ;;  %v330_v10 = vpack.c.bf16 %v326_v2, %v326_v2 }
  0xfe   :  { %v331_v6 = vpack.c.bf16 %v327_v4, %v327_v4  ;;  %v332_v11 = vpack.c.bf16 %v328_v3, %v328_v3 }
  0xff   :  { %v333_v7 = vpack.c.bf16 %v329_v5, %v329_v5 }
 0x100   :  { %570 = vmatprep.mubr.bf16.mxu0 %v331_v6 }
 0x101   :  { %816 = vmatprep.mubr.bf16.mxu1 %v333_v7  ;;  %571 = vmatmul.mubr.bf16.vlgmr.msra.gmra.mrb[8].mxu0 %v330_v10 }
 0x102   :  { %817 = vmatmul.mubr.bf16.vlgmr.msra.gmra.mrb[8].mxu1 %v332_v11  ;;  %1307 = vmatpush3.bf16.msra.mxu0 %v1466_v8 }
 0x103   :  { %1329 = vmatpush3.bf16.msra.mxu1 %v1467_v9  ;;  %1308 = vmatprep.subr.bf16.mxu0 %v1468_v12 }
 0x104   :  { %1330 = vmatprep.subr.bf16.mxu1 %v1469_v13 }
 0x106   :  { %1309 = vmatpush3.bf16.msra.mxu0 %v1470_v14  ;;  %v1305_v14 = vld [vmem:[%s1753_s8] ss:$0 sm:$0xff] }
 0x107   :  { %1331 = vmatpush3.bf16.msra.mxu1 %v1471_v15  ;;  %1310 = vmatprep.subr.bf16.mxu0 %v1472_v16 }
 0x108   :  { %1332 = vmatprep.subr.bf16.mxu1 %v1473_v17 }
 0x10a   :  { %1311 = vmatpush3.bf16.msra.mxu0 %v1474_v18 }
 0x10b   :  { %1333 = vmatpush3.bf16.msra.mxu1 %v1475_v19  ;;  %1312 = vmatprep.subr.bf16.mxu0 %v1476_v20 }
 0x10c   :  { %1334 = vmatprep.subr.bf16.mxu1 %v1477_v21 }
 0x10e   :  { %1313 = vmatpush3.bf16.msra.mxu0 %v1478_v22 }
 0x10f   :  { %1335 = vmatpush3.bf16.msra.mxu1 %v1479_v23  ;;  %1314 = vmatprep.subr.bf16.mxu0 %v1480_v24 }
 0x110   :  { %1336 = vmatprep.subr.bf16.mxu1 %v1481_v25 }
 0x112   :  { %1315 = vmatpush3.bf16.msra.mxu0 %v1482_v26 }
 0x113   :  { %1337 = vmatpush3.bf16.msra.mxu1 %v1483_v27  ;;  %1316 = vmatprep.subr.bf16.mxu0 %v1484_v28 }
 0x114   :  { %1338 = vmatprep.subr.bf16.mxu1 %v1485_v29 }
 0x116   :  { %1317 = vmatpush3.bf16.msra.mxu0 %v1486_v30 }
 0x117   :  { %1339 = vmatpush3.bf16.msra.mxu1 %v1487_v31  ;;  %1318 = vmatprep.subr.bf16.mxu0 %v1488_v32 }
 0x118   :  { %1340 = vmatprep.subr.bf16.mxu1 %v1489_v33 }
 0x11a   :  { %1319 = vmatpush3.bf16.msra.mxu0 %v1490_v34 }
 0x11b   :  { %1341 = vmatpush3.bf16.msra.mxu1 %v1491_v35  ;;  %1320 = vmatprep.subr.bf16.mxu0 %v1492_v36 }
 0x11c   :  { %1342 = vmatprep.subr.bf16.mxu1 %v1493_v38 }
 0x11e   :  { %1321 = vmatpush3.bf16.msra.mxu0 %v1494_v39 }
 0x11f   :  { %1343 = vmatpush3.bf16.msra.mxu1 %v1495_v41 }
 0x1d4   :  { %v572_v48 = vpop.f32.mrb[8].mxu0 }
 0x1d5   :  { %v818_v49 = vpop.f32.mrb[8].mxu1  ;;  %v573_v50 = vadd.f32 %v572_v48, %v371_v44  ;;  %v574_v52 = vpop.f32.mrb[9].mxu0 }
 0x1d6   :  { %v819_v51 = vadd.f32 %v818_v49, %v617_v45  ;;  %v820_v53 = vpop.f32.mrb[9].mxu1  ;;  %v575_v54 = vadd.f32 %v574_v52, %v375_v46  ;;  %v576_v56 = vpop.f32.mrb[10].mxu0 }
 0x1d7   :  { %v821_v55 = vadd.f32 %v820_v53, %v621_v47  ;;  %v822_v57 = vpop.f32.mrb[10].mxu1  ;;  %v825_v58 = vmul.f32 0.01, %v573_v50  ;;  %v577_v60 = vpop.f32.mrb[11].mxu0 }
 0x1d8   :  { %v831_v59 = vmul.f32 0.01, %v819_v51  ;;  %v823_v61 = vpop.f32.mrb[11].mxu1  ;;  %v826_v62 = vmul.f32 0.01, %v575_v54 }
 0x1d9   :  { %v832_v37 = vmul.f32 0.01, %v821_v55  ;;  %v827_v63 = vmax.f32 %v573_v50, %v825_v58 }
 0x1da   :  { %v833_v0 = vmax.f32 %v819_v51, %v831_v59  ;;  %v828_v1 = vmax.f32 %v575_v54, %v826_v62 }
 0x1db   :  { %v834_v40 = vmax.f32 %v821_v55, %v832_v37  ;;  %v829_v4 = vpack.c.bf16 %v827_v63, %v827_v63 }
 0x1dc   :  { %v830_v2 = vpack.c.bf16 %v828_v1, %v828_v1  ;;  %v835_v5 = vpack.c.bf16 %v833_v0, %v833_v0 }
 0x1dd   :  { %v836_v3 = vpack.c.bf16 %v834_v40, %v834_v40 }
 0x1de   :  { %1165 = vmatprep.mubr.bf16.mxu1 %v830_v2 }
 0x1df   :  { %1029 = vmatprep.mubr.bf16.mxu0 %v836_v3  ;;  %1166 = vmatmul.mubr.bf16.vlgmr.msra.gmra.mrb[12].mxu1 %v829_v4 }
 0x1e0   :  { %1030 = vmatmul.mubr.bf16.vlgmr.msra.gmra.mrb[12].mxu0 %v835_v5 }
 0x2b2   :  { %v1344_v7 = vpop.f32.mrb[12].mxu1 }
 0x2b3   :  { %v1322_v6 = vpop.f32.mrb[12].mxu0  ;;  %v1345_v9 = vpop.f32.mrb[13].mxu1 }
 0x2b4   :  { %v1323_v8 = vpop.f32.mrb[13].mxu0  ;;  %v1346_v11 = vadd.f32 %v1345_v9, %v1344_v7  ;;  %v1347_v13 = vpop.f32.mrb[14].mxu1 }
 0x2b5   :  { %v1324_v10 = vadd.f32 %v1323_v8, %v1322_v6  ;;  %v1325_v12 = vpop.f32.mrb[14].mxu0  ;;  %v1348_v16 = vpop.f32.mrb[15].mxu1 }
 0x2b6   :  { %v1326_v15 = vpop.f32.mrb[15].mxu0 }
 0x2b7   :  { %v1168_v17 = vadd.f32 %v1346_v11, %v1324_v10 }
 0x2b9   :  { %v1180_v18 = vadd.f32 %v1305_v14, %v1168_v17 }
 0x2bb   :  { %1182 = vst.msk [vmem:[%s1754_s9] sm:$0xff] %vm1181_vm3, %v1180_v18 }
 0x2bc   :  { %1187 = vsyncpa [#allocation3], 1 }

</bundles_post_ra>
